<compile_context>
chip_gen: v5e
topology: v5e:2x2
jax: 0.10.0
libtpu: 0.0.40
codegen_flags: <defaults>
</compile_context>

<pallas_src>
import functools

import jax
import jax.numpy as jnp
from jax.experimental import pallas as pl
from jax.experimental.pallas import tpu as pltpu


def _discriminator_kernel(x_ref, w1_ref, b1_ref, w2_ref, b2_ref, w3_ref, b3_ref,
                          o_ref, *, compute_dtype):
    # x arrives as the original f32 tile; cast to the MXU dtype here (one VPU
    # cast per tile, hidden under the MXU / next-tile DMA).
    x = x_ref[...].astype(compute_dtype)

    # Layer 1: [TM, D] @ [D, 256] on the MXU, f32 accumulation.
    h1 = jnp.dot(x, w1_ref[...], preferred_element_type=jnp.float32)
    h1 = jnp.maximum(h1 + b1_ref[...], 0.0)

    # Layer 2: [TM, 256] @ [256, 128].
    h2 = jnp.dot(h1.astype(compute_dtype), w2_ref[...],
                 preferred_element_type=jnp.float32)
    h2 = jnp.maximum(h2 + b2_ref[...], 0.0)

    # Layer 3 (out_features=1): VPU multiply + lane (XLU) reduction in f32
    # instead of an N=1 MXU matmul.  w3 is passed as a (1, 128) row, b3 is a
    # scalar living in SMEM.
    logit = jnp.sum(h2 * w3_ref[...], axis=-1, keepdims=True) + b3_ref[0, 0]  # (TM, 1)

    # Lane-dense epilogue: sigmoid (EUP) on the compact (1, TM) row, unmasked
    # store into the (1, B) output slab.
    o_ref[...] = jax.nn.sigmoid(logit.T)


def _round_up(x, m):
    return ((x + m - 1) // m) * m


def _choose_tm(B, D):
    """Pick the batch tile: ~4 MiB of f32 x per tile, multiple of 128, in [128, 8192]."""
    tm = (4 << 20) // (4 * D)
    tm = max(128, min(8192, (tm // 128) * 128))
    # Prefer >=2 grid steps when the batch allows it so v7x's two TensorCores
    # both get work (dimension_semantics=("parallel",) shards the batch grid).
    if B >= 256:
        tm = min(tm, _round_up(pl.cdiv(B, 2), 128))
    return tm


def discriminator_forward(x, params, *, block_batch=None, compute_dtype=jnp.bfloat16):
    """Fused forward pass of the Discriminator MLP.

    x: [B, D] float32
    params: (w1 [D,256], b1 [*,256], w2 [256,128], b2 [*,128], w3 [128,1], b3 [1])
    returns: [B, 1] float32 in (0, 1)

    compute_dtype: MXU stream dtype (bf16 by default, ~0.4% input rounding with
    f32 accumulation; pass jnp.float32 for a bit-closer match to the reference).
    """
    w1, b1, w2, b2, w3, b3 = params
    B, D = x.shape

    # Trace-time shape checks: the kernel hard-codes the 256/128/1 hidden widths.
    assert w1.shape == (D, 256), w1.shape
    assert b1.size == 256 and b2.size == 128 and b3.size == 1
    assert w2.shape == (256, 128), w2.shape
    assert w3.size == 128, w3.shape

    # Batch tiling (no host padding; Pallas handles the ragged trailing block).
    tm = block_batch if block_batch is not None else _choose_tm(B, D)
    if tm >= B:
        TM, num_tiles = B, 1            # block == full array dims -> always legal
    else:
        TM = max(128, (tm // 128) * 128)  # lane-dense out blocks, sublane-aligned x
        num_tiles = pl.cdiv(B, TM)

    # One-off casts/reshapes of the (tiny) parameters.
    w1c = w1.astype(compute_dtype)
    w2c = w2.astype(compute_dtype)
    b1r = b1.reshape(1, 256).astype(jnp.float32)
    b2r = b2.reshape(1, 128).astype(jnp.float32)
    w3r = w3.reshape(1, 128).astype(jnp.float32)   # layer-3 VPU path stays f32
    b3r = b3.reshape(1, 1).astype(jnp.float32)     # scalar -> SMEM

    # VMEM budget: double-buffered x tile + resident weights + f32 intermediates,
    # plus slack; capped at 48 MiB so we never collide with v7x's 64 MiB VMEM.
    itemsize_x = jnp.dtype(x.dtype).itemsize
    itemsize_w = jnp.dtype(compute_dtype).itemsize
    vmem_need = (2 * TM * D * itemsize_x                 # double-buffered x
                 + (D * 256 + 256 * 128) * itemsize_w    # resident w1, w2
                 + TM * (256 + 128) * 4                  # h1, h2 intermediates (f32)
                 + 2 * TM * 4                            # double-buffered output row
                 + (256 + 128 + 128 + 1) * 4)            # biases / w3 row
    vmem_limit = int(min(max(vmem_need + (8 << 20), 32 << 20), 48 << 20))

    flops = 2 * B * (D * 256 + 256 * 128 + 128)
    bytes_accessed = (B * D * itemsize_x
                      + (D * 256 + 256 * 128) * itemsize_w
                      + (256 + 128 + 128 + 1) * 4
                      + B * 4)
    cost = pl.CostEstimate(flops=flops, transcendentals=2 * B,
                           bytes_accessed=bytes_accessed)

    out_row = pl.pallas_call(
        functools.partial(_discriminator_kernel, compute_dtype=compute_dtype),
        out_shape=jax.ShapeDtypeStruct((1, B), jnp.float32),
        grid=(num_tiles,),
        in_specs=[
            pl.BlockSpec((TM, D), lambda i: (i, 0)),             # x: streamed, unpadded f32
            pl.BlockSpec((D, 256), lambda i: (0, 0)),            # w1: VMEM-resident
            pl.BlockSpec((1, 256), lambda i: (0, 0)),            # b1
            pl.BlockSpec((256, 128), lambda i: (0, 0)),          # w2
            pl.BlockSpec((1, 128), lambda i: (0, 0)),            # b2
            pl.BlockSpec((1, 128), lambda i: (0, 0)),            # w3 as a row
            pl.BlockSpec(memory_space=pltpu.MemorySpace.SMEM),   # b3 scalar
        ],
        out_specs=pl.BlockSpec((1, TM), lambda i: (0, i)),       # lane-dense output row
        compiler_params=pltpu.CompilerParams(
            dimension_semantics=("parallel",),
            vmem_limit_bytes=vmem_limit,
        ),
        cost_estimate=cost,
    )(x, w1c, b1r, w2c, b2r, w3r, b3r)

    return out_row[0][:, None]   # (B, 1); drops any ragged-tile garbage columns


def init_params(key, input_dim):
    """Deterministic parameter init matching the PyTorch module's shapes."""
    k1, k2, k3, k4, k5, k6 = jax.random.split(key, 6)
    s1 = 1.0 / jnp.sqrt(input_dim)
    s2 = 1.0 / jnp.sqrt(256.0)
    s3 = 1.0 / jnp.sqrt(128.0)
    w1 = jax.random.uniform(k1, (input_dim, 256), jnp.float32, -s1, s1)
    b1 = jax.random.uniform(k2, (1, 256), jnp.float32, -s1, s1)
    w2 = jax.random.uniform(k3, (256, 128), jnp.float32, -s2, s2)
    b2 = jax.random.uniform(k4, (1, 128), jnp.float32, -s2, s2)
    w3 = jax.random.uniform(k5, (128, 1), jnp.float32, -s3, s3)
    b3 = jax.random.uniform(k6, (1, 1), jnp.float32, -s3, s3)
    return (w1, b1, w2, b2, w3, b3)


def _reference_forward(x, params):
    w1, b1, w2, b2, w3, b3 = params
    h1 = jnp.maximum(x @ w1 + b1, 0.0)
    h2 = jnp.maximum(h1 @ w2 + b2, 0.0)
    return jax.nn.sigmoid(h2 @ w3 + b3)


if __name__ == "__main__":
    key = jax.random.PRNGKey(0)
    kx, kx2, kp = jax.random.split(key, 3)

    batch, input_dim = 8, 64
    x = jax.random.normal(kx, (batch, input_dim), dtype=jnp.float32)
    params = init_params(kp, input_dim)

    # Single-tile path (block == full array dims).
    out = jax.block_until_ready(discriminator_forward(x, params))
    ref = _reference_forward(x, params)
    assert out.shape == (batch, 1)
    assert jnp.allclose(out, ref, atol=2e-2, rtol=2e-2), float(jnp.max(jnp.abs(out - ref)))

    # Multi-tile grid path with a ragged last tile (300 = 2*128 + 44, no host padding).
    batch2 = 300
    x2 = jax.random.normal(kx2, (batch2, input_dim), dtype=jnp.float32)
    out2 = jax.block_until_ready(discriminator_forward(x2, params, block_batch=128))
    ref2 = _reference_forward(x2, params)
    assert out2.shape == (batch2, 1)
    assert jnp.allclose(out2, ref2, atol=2e-2, rtol=2e-2), float(jnp.max(jnp.abs(out2 - ref2)))

    # Auto-tiled path (>=2 tiles chosen so both v7x TensorCores get work).
    out3 = jax.block_until_ready(discriminator_forward(x2, params))
    assert out3.shape == (batch2, 1)
    assert jnp.allclose(out3, ref2, atol=2e-2, rtol=2e-2), float(jnp.max(jnp.abs(out3 - ref2)))

    print("KERNEL_OK")
</pallas_src>

<mosaic_0001>
module attributes {stable_mosaic.version = 11 : i64} {
  func.func @_discriminator_kernel(%arg0: i32, %arg1: memref<8x64xf32, #tpu.memory_space<vmem>>, %arg2: memref<64x256xbf16, #tpu.memory_space<vmem>>, %arg3: memref<1x256xf32, #tpu.memory_space<vmem>>, %arg4: memref<256x128xbf16, #tpu.memory_space<vmem>>, %arg5: memref<1x128xf32, #tpu.memory_space<vmem>>, %arg6: memref<1x128xf32, #tpu.memory_space<vmem>>, %arg7: memref<1x1xf32, #tpu.memory_space<smem>>, %arg8: memref<1x8xf32, #tpu.memory_space<vmem>>) attributes {dimension_semantics = [#tpu.dimension_semantics<parallel>], iteration_bounds = array<i64: 1>, scalar_prefetch = 0 : i64, scratch_operands = 0 : i64, tpu.core_type = #tpu.core_type<tc>, window_params = [{transform_indices = @transform_0, window_bounds = array<i64: 8, 64>}, {pipeline_mode = #tpu.pipeline_mode<synchronous>, transform_indices = @transform_1, window_bounds = array<i64: 64, 256>}, {pipeline_mode = #tpu.pipeline_mode<synchronous>, transform_indices = @transform_2, window_bounds = array<i64: 1, 256>}, {pipeline_mode = #tpu.pipeline_mode<synchronous>, transform_indices = @transform_3, window_bounds = array<i64: 256, 128>}, {pipeline_mode = #tpu.pipeline_mode<synchronous>, transform_indices = @transform_4, window_bounds = array<i64: 1, 128>}, {pipeline_mode = #tpu.pipeline_mode<synchronous>, transform_indices = @transform_5, window_bounds = array<i64: 1, 128>}, {transform_indices = @transform_6, window_bounds = array<i64: 1, 1>}, {transform_indices = @transform_7, window_bounds = array<i64: 1, 8>}]} {
    %c0 = arith.constant 0 : index
    %c0_0 = arith.constant 0 : index
    %0 = vector.load %arg1[%c0, %c0_0] : memref<8x64xf32, #tpu.memory_space<vmem>>, vector<8x64xf32>
    %1 = arith.truncf %0 : vector<8x64xf32> to vector<8x64xbf16>
    %c0_1 = arith.constant 0 : index
    %c0_2 = arith.constant 0 : index
    %2 = vector.load %arg2[%c0_1, %c0_2] : memref<64x256xbf16, #tpu.memory_space<vmem>>, vector<64x256xbf16>
    %cst = arith.constant dense<0.000000e+00> : vector<8x256xf32>
    %3 = tpu.matmul %1, %2, %cst {dimension_numbers = #tpu.dot_dimension_numbers<[1], [0], [0], [1], [0, 0, 1, 1], [], []>} : vector<8x64xbf16>, vector<64x256xbf16>, vector<8x256xf32> -> vector<8x256xf32>
    %c0_3 = arith.constant 0 : index
    %c0_4 = arith.constant 0 : index
    %4 = vector.load %arg3[%c0_3, %c0_4] : memref<1x256xf32, #tpu.memory_space<vmem>>, vector<1x256xf32>
    %5 = vector.broadcast %4 : vector<1x256xf32> to vector<8x256xf32>
    %6 = arith.addf %3, %5 : vector<8x256xf32>
    %cst_5 = arith.constant 0.000000e+00 : f32
    %7 = vector.broadcast %cst_5 : f32 to vector<8x256xf32>
    %8 = arith.maximumf %6, %7 : vector<8x256xf32>
    %9 = arith.truncf %8 : vector<8x256xf32> to vector<8x256xbf16>
    %c0_6 = arith.constant 0 : index
    %c0_7 = arith.constant 0 : index
    %10 = vector.load %arg4[%c0_6, %c0_7] : memref<256x128xbf16, #tpu.memory_space<vmem>>, vector<256x128xbf16>
    %cst_8 = arith.constant dense<0.000000e+00> : vector<8x128xf32>
    %11 = tpu.matmul %9, %10, %cst_8 {dimension_numbers = #tpu.dot_dimension_numbers<[1], [0], [0], [1], [0, 0, 1, 1], [], []>} : vector<8x256xbf16>, vector<256x128xbf16>, vector<8x128xf32> -> vector<8x128xf32>
    %c0_9 = arith.constant 0 : index
    %c0_10 = arith.constant 0 : index
    %12 = vector.load %arg5[%c0_9, %c0_10] : memref<1x128xf32, #tpu.memory_space<vmem>>, vector<1x128xf32>
    %13 = vector.broadcast %12 : vector<1x128xf32> to vector<8x128xf32>
    %14 = arith.addf %11, %13 : vector<8x128xf32>
    %cst_11 = arith.constant 0.000000e+00 : f32
    %15 = vector.broadcast %cst_11 : f32 to vector<8x128xf32>
    %16 = arith.maximumf %14, %15 : vector<8x128xf32>
    %c0_12 = arith.constant 0 : index
    %c0_13 = arith.constant 0 : index
    %17 = vector.load %arg6[%c0_12, %c0_13] : memref<1x128xf32, #tpu.memory_space<vmem>>, vector<1x128xf32>
    %18 = vector.broadcast %17 : vector<1x128xf32> to vector<8x128xf32>
    %19 = arith.mulf %16, %18 : vector<8x128xf32>
    %cst_14 = arith.constant dense<0.000000e+00> : vector<8xf32>
    %20 = vector.multi_reduction <add>, %19, %cst_14 [1] : vector<8x128xf32> to vector<8xf32>
    %21 = vector.shape_cast %20 : vector<8xf32> to vector<8x1xf32>
    %c0_15 = arith.constant 0 : index
    %c0_16 = arith.constant 0 : index
    %22 = memref.load %arg7[%c0_15, %c0_16] : memref<1x1xf32, #tpu.memory_space<smem>>
    %23 = vector.broadcast %22 : f32 to vector<8x1xf32>
    %24 = arith.addf %21, %23 : vector<8x1xf32>
    %25 = tpu.transpose %24, [1, 0] : vector<8x1xf32> -> vector<1x8xf32>
    %26 = arith.negf %25 : vector<1x8xf32>
    %27 = math.exp %26 : vector<1x8xf32>
    %cst_17 = arith.constant 1.000000e+00 : f32
    %28 = vector.broadcast %cst_17 : f32 to vector<1x8xf32>
    %29 = arith.addf %28, %27 : vector<1x8xf32>
    %30 = arith.divf %28, %29 : vector<1x8xf32>
    %c0_18 = arith.constant 0 : index
    %c0_19 = arith.constant 0 : index
    %31 = vector.load %arg8[%c0_18, %c0_19] : memref<1x8xf32, #tpu.memory_space<vmem>>, vector<1x8xf32>
    tpu.vector_store %arg8[%c0_18, %c0_19], %30 {strides = array<i32>} : memref<1x8xf32, #tpu.memory_space<vmem>>, vector<1x8xf32>,
    return
  }
  func.func @transform_0(%arg0: i32) -> (i32, i32) {
    %c0_i32 = arith.constant 0 : i32
    %c0_i32_0 = arith.constant 0 : i32
    return %arg0, %c0_i32 : i32, i32
  }
  func.func @transform_1(%arg0: i32) -> (i32, i32) {
    %c0_i32 = arith.constant 0 : i32
    %c0_i32_0 = arith.constant 0 : i32
    %c0_i32_1 = arith.constant 0 : i32
    return %c0_i32, %c0_i32_0 : i32, i32
  }
  func.func @transform_2(%arg0: i32) -> (i32, i32) {
    %c0_i32 = arith.constant 0 : i32
    %c0_i32_0 = arith.constant 0 : i32
    %c0_i32_1 = arith.constant 0 : i32
    return %c0_i32, %c0_i32_0 : i32, i32
  }
  func.func @transform_3(%arg0: i32) -> (i32, i32) {
    %c0_i32 = arith.constant 0 : i32
    %c0_i32_0 = arith.constant 0 : i32
    %c0_i32_1 = arith.constant 0 : i32
    return %c0_i32, %c0_i32_0 : i32, i32
  }
  func.func @transform_4(%arg0: i32) -> (i32, i32) {
    %c0_i32 = arith.constant 0 : i32
    %c0_i32_0 = arith.constant 0 : i32
    %c0_i32_1 = arith.constant 0 : i32
    return %c0_i32, %c0_i32_0 : i32, i32
  }
  func.func @transform_5(%arg0: i32) -> (i32, i32) {
    %c0_i32 = arith.constant 0 : i32
    %c0_i32_0 = arith.constant 0 : i32
    %c0_i32_1 = arith.constant 0 : i32
    return %c0_i32, %c0_i32_0 : i32, i32
  }
  func.func @transform_6(%arg0: i32) -> (i32, i32) {
    %c0_i32 = arith.constant 0 : i32
    %c0_i32_0 = arith.constant 0 : i32
    %c0_i32_1 = arith.constant 0 : i32
    return %c0_i32, %c0_i32_0 : i32, i32
  }
  func.func @transform_7(%arg0: i32) -> (i32, i32) {
    %c0_i32 = arith.constant 0 : i32
    %c0_i32_0 = arith.constant 0 : i32
    return %c0_i32, %arg0 : i32, i32
  }
}

</mosaic_0001>

<bundles_post_ra>
// kernel: tpu_custom_call.1
= control target key start
LH: loop header
LB: loop body
LE: loop exit
PB: predicated region body
PF: predicated region fallthrough
CT: control target
= control target key end

     0   :  { %13 = vsyncpa [#allocation4], 0  ;;  %s716_s0 = inlined_call_operand.hbm [shape: f32[8,64], index: 0, kind: input, shape index: {}]   ;;  %s717_s1 = inlined_call_operand.hbm [shape: bf16[64,256], index: 1, kind: input, shape index: {}]   ;;  %s718_s2 = inlined_call_operand.vmem [shape: f32[1,256], index: 2, kind: input, shape index: {}]   ;;  %s719_s3 = inlined_call_operand.hbm [shape: bf16[256,128], index: 3, kind: input, shape index: {}]   ;;  %s720_s4 = inlined_call_operand.vmem [shape: f32[1,128], index: 4, kind: input, shape index: {}]   ;;  %s721_s5 = inlined_call_operand.vmem [shape: f32[1,128], index: 5, kind: input, shape index: {}]   ;;  %s722_s6 = inlined_call_operand.<no memory space> [shape: f32[1,1], index: 6, kind: input, shape index: {}]   ;;  %s723_s7 = inlined_call_operand.hbm [shape: f32[1,8], index: 7, kind: output, shape index: {}]  }
   0x1   :  { %14 = vsyncpa [#allocation7], 0  ;;  %s31_s26 = sshll.u32 %s717_s1, 4  ;;  %s32_s26 = int_to_ptr.hbm [resolvable:$true] %s31_s26 }
   0x2   :  { %15 = vsyncpa [#allocation5], 0  ;;  %s644_s27 = smov [#allocation6]   ;;  %s21_s8 = sshll.u32 %s716_s0, 4  ;;  %s22_s8 = int_to_ptr.hbm [resolvable:$true] %s21_s8 }
   0x3   :  { %s33_s28 = sshll.u32 %s644_s27, 4  ;;  %s645_s9 = smov 128   ;;  %s34_s28 = int_to_ptr.vmem [resolvable:$true] %s33_s28 }
   0x4   :  { %s646_s10 = smov 8   ;;  %s647_s11 = smov [#allocation3]  }
   0x5   :  { %39 = dma.hbm_to_vmem [thread:$0]  %s32_s26, 1024, %s34_s28, [#allocation7], %s645_s9, %s645_s9, %s646_s10  }
   0x6   :  { %s23_s12 = sshll.u32 %s647_s11, 4  ;;  %s46_s15 = sshll.u32 %s719_s3, 4  ;;  %s24_s12 = int_to_ptr.vmem [resolvable:$true] %s23_s12  ;;  %s47_s15 = int_to_ptr.hbm [resolvable:$true] %s46_s15 }
   0x7   :  { %26 = dma.hbm_to_vmem [thread:$0]  %s22_s8, 128, %s24_s12, [#allocation4]  }
   0x8   :  { %s648_s1 = smov [#allocation8]   ;;  %s649_s17 = smov 64  }
   0x9   :  { %s48_s16 = sshll.u32 %s648_s1, 4  ;;  %s650_s18 = smov 4   ;;  %s49_s16 = int_to_ptr.vmem [resolvable:$true] %s48_s16 }
   0xa   :  { %54 = dma.hbm_to_vmem [thread:$0]  %s47_s15, 2048, %s49_s16, [#allocation7], %s649_s17, %s649_s17, %s650_s18  }
   0xb   :  { %638 = dma.done.wait [#allocation4], 128  }
   0xc   :  { %639 = vsyncadd [#allocation4], 4294967168 }
   0xd   :  { %640 = dma.done.wait [#allocation7], 3072  }
   0xe   :  { %641 = vsyncadd [#allocation7], 4294964224  ;;  %v430_v0 = vld [vmem:[#allocation6 + $0x30] sm:$0xf]  ;;  %v510_v1 = vld [vmem:[#allocation6 + $0x34] sm:$0xf0] }
   0xf   :  { %v509_v2 = vld [vmem:[#allocation6 + $0x34] sm:$0xf]  ;;  %v431_v3 = vor.u32 %v510_v1, %v430_v0  ;;  %v432_v4 = vld [vmem:[#allocation6 + $0x38] sm:$0xf0]  ;;  %v422_v5 = vld [vmem:[#allocation6 + $0x20] sm:$0xf]  ;;  %v331_v1 = vstv %s722_s6 }
  0x10   :  { %v508_v6 = vld [vmem:[#allocation6 + $0x24] sm:$0xf0]  ;;  %v435_v7 = vor.u32 %v509_v2, %v432_v4  ;;  %v507_v8 = vld [vmem:[#allocation6 + $0x24] sm:$0xf]  ;;  %v424_v9 = vld [vmem:[#allocation6 + $0x28] sm:$0xf0] }
  0x11   :  { %138 = vmatpush.bf16.msra.mxu0 %v431_v3  ;;  %v423_v10 = vor.u32 %v508_v6, %v422_v5  ;;  %v427_v11 = vor.u32 %v507_v8, %v424_v9  ;;  %v414_v12 = vld [vmem:[#allocation6 + $0x10] sm:$0xf]  ;;  %v506_v13 = vld [vmem:[#allocation6 + $0x14] sm:$0xf0]  ;;  %v505_v14 = vld [vmem:[#allocation6 + $0x14] sm:$0xf] }
  0x12   :  { %151 = vmatpush.bf16.msra.mxu1 %v435_v7  ;;  %v416_v15 = vld [vmem:[#allocation6 + $0x18] sm:$0xf0]  ;;  %v415_v18 = vor.u32 %v506_v13, %v414_v12  ;;  %v517_v19 = vld [vmem:[#allocation8 + $0x30] sm:$0xff]  ;;  %v406_v21 = vld [vmem:[#allocation6] sm:$0xf]  ;;  %vm130_vm0 = vcmask 523264  }
  0x13   :  { %v518_v16 = vld [vmem:[#allocation8 + $0x38] sm:$0xff]  ;;  %v419_v20 = vor.u32 %v505_v14, %v416_v15  ;;  %v504_v22 = vld [vmem:[#allocation6 + $0x4] sm:$0xf0]  ;;  %v525_v23 = vld [vmem:[#allocation8 + $0x70] sm:$0xff]  ;;  %s393_s25 = sshll.u32 %s723_s7, 4  ;;  %vm384_vm4 = vcmask 57344   ;;  %s394_s25 = int_to_ptr.hbm [resolvable:$true] %s393_s25 }
  0x14   :  { %v526_v17 = vld [vmem:[#allocation8 + $0x78] sm:$0xff]  ;;  %296 = vmatpush.bf16.msra.mxu2 %v518_v16  ;;  %v503_v24 = vld [vmem:[#allocation6 + $0x4] sm:$0xf]  ;;  %v408_v25 = vld [vmem:[#allocation6 + $0x8] sm:$0xf0]  ;;  %v407_v26 = vor.u32 %v504_v22, %v406_v21 }
  0x15   :  { %139 = vmatpush.bf16.msra.mxu0 %v423_v10  ;;  %309 = vmatpush.bf16.msra.mxu3 %v526_v17  ;;  %v74_v27 = vld [vmem:[#allocation3] sm:$0xff]  ;;  %v516_v28 = vld [vmem:[#allocation8 + $0x28] sm:$0xff]  ;;  %v411_v29 = vor.u32 %v503_v24, %v408_v25  ;;  %v515_v32 = vld [vmem:[#allocation8 + $0x20] sm:$0xff] }
  0x16   :  { %152 = vmatpush.bf16.msra.mxu1 %v427_v11  ;;  %v524_v30 = vld [vmem:[#allocation8 + $0x68] sm:$0xff]  ;;  %v75_v31 = vpack.c.bf16 %v74_v27, %v74_v27  ;;  %v523_v33 = vld [vmem:[#allocation8 + $0x60] sm:$0xff]  ;;  %v514_v34 = vld [vmem:[#allocation8 + $0x18] sm:$0xff] }
  0x17   :  { %v522_v35 = vld [vmem:[#allocation8 + $0x58] sm:$0xff]  ;;  %v513_v36 = vld [vmem:[#allocation8 + $0x10] sm:$0xff]  ;;  %v512_v38 = vld [vmem:[#allocation8 + $0x8] sm:$0xff] }
  0x18   :  { %297 = vmatpush.bf16.msra.mxu2 %v517_v19  ;;  %v521_v37 = vld [vmem:[#allocation8 + $0x50] sm:$0xff]  ;;  %v520_v39 = vld [vmem:[#allocation8 + $0x48] sm:$0xff]  ;;  %v511_v40 = vld [vmem:[#allocation8] sm:$0xff] }
  0x19   :  { %140 = vmatpush.bf16.msra.mxu0 %v415_v18  ;;  %310 = vmatpush.bf16.msra.mxu3 %v525_v23  ;;  %v519_v41 = vld [vmem:[#allocation8 + $0x40] sm:$0xff]  ;;  %v84_v42 = vld [vmem:[%s718_s2] sm:$0x3] }
  0x1a   :  { %153 = vmatpush.bf16.msra.mxu1 %v419_v20  ;;  %v86_v43 = vperm.slane %v84_v42, 0  ;;  %v87_v44 = vperm.slane %v84_v42, 1  ;;  %v536_v55 = vld [vmem:[%s720_s4] ss:$0 sm:$0xff]  ;;  %s651_s4 = smov [#allocation9]  }
  0x1b   :  { %v537_v60 = vld [vmem:[%s721_s5] ss:$0 sm:$0xff]  ;;  %s391_s5 = sshll.u32 %s651_s4, 4  ;;  %s392_s5 = int_to_ptr.vmem [resolvable:$true] %s391_s5 }
  0x1c   :  { %298 = vmatpush.bf16.msra.mxu2 %v516_v28 }
  0x1d   :  { %141 = vmatpush.bf16.msra.mxu0 %v407_v26  ;;  %311 = vmatpush.bf16.msra.mxu3 %v524_v30 }
  0x1e   :  { %154 = vmatpush.bf16.msra.mxu1 %v411_v29 }
  0x20   :  { %436 = vmatmul.msk.bf16.vlgmr.msra.gmra.mxu0 %vm130_vm0, %v75_v31  ;;  %299 = vmatpush.bf16.msra.mxu2 %v515_v32 }
  0x21   :  { %437 = vmatmul.msk.bf16.vlgmr.msra.gmra.mxu1 %vm130_vm0, %v75_v31  ;;  %312 = vmatpush.bf16.msra.mxu3 %v523_v33 }
  0x24   :  { %300 = vmatpush.bf16.msra.mxu2 %v514_v34 }
  0x25   :  { %313 = vmatpush.bf16.msra.mxu3 %v522_v35 }
  0x28   :  { %301 = vmatpush.bf16.msra.mxu2 %v513_v36 }
  0x29   :  { %314 = vmatpush.bf16.msra.mxu3 %v521_v37 }
  0x2c   :  { %302 = vmatpush.bf16.msra.mxu2 %v512_v38 }
  0x2d   :  { %315 = vmatpush.bf16.msra.mxu3 %v520_v39 }
  0x30   :  { %303 = vmatpush.bf16.msra.mxu2 %v511_v40 }
  0x31   :  { %316 = vmatpush.bf16.msra.mxu3 %v519_v41 }
  0x9d   :  { %v143_v45 = vpop.f32.mrf.mxu0 }
  0x9e   :  { %v144_v46 = vadd.f32 %v143_v45, %v86_v43  ;;  %v156_v47 = vpop.f32.mrf.mxu1 }
  0x9f   :  { %v157_v48 = vadd.f32 %v156_v47, %v87_v44 }
  0xa0   :  { %v160_v49 = vmax.f32 %v144_v46, 0.0 }
  0xa1   :  { %v161_v50 = vmax.f32 %v157_v48, 0.0 }
  0xa2   :  { %v162_v51 = vpack.c.bf16 %v160_v49, %v160_v49 }
  0xa3   :  { %v163_v52 = vpack.c.bf16 %v161_v50, %v161_v50 }
  0xa4   :  { %304 = vmatmul.bf16.vlgmr.msra.gmra.mxu2 %v162_v51 }
  0xa5   :  { %317 = vmatmul.bf16.vlgmr.msra.gmra.mxu3 %v163_v52  ;;  %v145_v53 = vpop.f32.mrf.mxu0 }
  0xa6   :  { %v158_v54 = vpop.f32.mrf.mxu1 }
 0x127   :  { %v305_v56 = vpop.f32.mrf.mxu2 }
 0x128   :  { %v306_v57 = vadd.f32 %v536_v55, %v305_v56  ;;  %v318_v58 = vpop.f32.mrf.mxu3 }
 0x12a   :  { %v319_v59 = vadd.f32 %v318_v58, %v306_v57 }
 0x12c   :  { %v322_v61 = vmax.f32 %v319_v59, 0.0 }
 0x12e   :  { %v327_v62 = vmul.f32 %v537_v60, %v322_v61 }
 0x12f   :  { %v307_v63 = vpop.f32.mrf.mxu2 }
 0x130   :  { %v320_v0 = vpop.f32.mrf.mxu3  ;;  %328 = vadd.xlane.f32.xlu0 %v327_v62 }
 0x1a3   :  { %v329_v2 = vpop.xlane.xlu0 %328 }
 0x1a4   :  { %v332_v3 = vadd.f32 %v331_v1, %v329_v2 }
 0x1a6   :  { %333 = vxpose.xlu0.b32.start.end [1/1] (short) (narrow) %v332_v3, 8 }
 0x24a   :  { %v349_v4 = vpop.trf.xlu0 }
 0x24b   :  { %v502_v5 = vmul.f32 -1.442695, %v349_v4 }
 0x24d   :  { %538 = vpow2.f32 %v502_v5 }
 0x253   :  { %v539_v6 = vpop.eup %538 }
 0x254   :  { %v368_v7 = vadd.f32 1.0, %v539_v6 }
 0x256   :  { %540 = vrcp.f32 %v368_v7  ;;  %v380_v11 = vand.u32 2147483648, %v368_v7  ;;  %v378_v13 = vand.u32 2147483647, %v368_v7  ;;  %vm374_vm2 = vweird.f32 %v368_v7 }
 0x258   :  { %v381_v15 = vor.u32 1.1754944e-38, %v380_v11  ;;  %vm379_vm5 = vcmp.eq.f32.partialorder %v378_v13, 8.507059e+37 }
 0x25c   :  { %v541_v8 = vpop.eup %540 }
 0x25d   :  { %v370_v9 = vmul.f32 %v541_v8, %v368_v7  ;;  %vm375_vm1 = vweird.f32 %v541_v8 }
 0x25e   :  { %vm376_vm3 = vmor %vm374_vm2, %vm375_vm1 }
 0x25f   :  { %v371_v10 = vsub.f32 1.0, %v370_v9 }
 0x261   :  { %v372_v12 = vmul.f32 %v541_v8, %v371_v10 }
 0x263   :  { %v373_v14 = vadd.f32 %v541_v8, %v372_v12 }
 0x265   :  { %v377_v16 = vsel %vm376_vm3, %v541_v8, %v373_v14 }
 0x266   :  { %v382_v17 = vsel %vm379_vm5, %v381_v15, %v377_v16 }
 0x267   :  { %385 = vst.msk [vmem:[#allocation9] sm:$0x1] %vm384_vm4, %v382_v17 }
 0x268   :  { %396 = dma.vmem_to_hbm [thread:$0]  %s392_s5, 16, %s394_s25, [#allocation5]  }
 0x269   :  { %642 = dma.done.wait [#allocation5], 16  }
 0x26a   :  { %643 = vsyncadd [#allocation5], 4294967280 }
 0x26b   :  { %401 = vsyncpa [#allocation4], 1 }
 0x26c   :  { %402 = vsyncpa [#allocation7], 1 }
 0x26d   :  { %403 = vsyncpa [#allocation5], 1 }

</bundles_post_ra>
